<compile_context>
chip_gen: v7x
topology: tpu7x:2x2x1
jax: 0.10.0
libtpu: 0.0.40
codegen_flags: <defaults>
</compile_context>

<pallas_src>
import jax
import jax.numpy as jnp
from jax.experimental import pallas as pl
from jax.experimental.pallas import tpu as pltpu

LANE = 128        # lane width: last-dim alignment for vregs / MXU columns
ROW_ALIGN = 16    # batch-tile row alignment (covers bf16 sublane packing)


def _cdiv(a, b):
    return -(-a // b)


def _round_up(x, m):
    return _cdiv(x, m) * m


def _pad2(a, rows, cols, dtype):
    a = jnp.asarray(a, dtype=dtype)
    pr, pc = rows - a.shape[0], cols - a.shape[1]
    if pr or pc:
        a = jnp.pad(a, ((0, pr), (0, pc)))
    return a


def _vmem_budget_bytes():
    """Usable VMEM per TensorCore, leaving headroom for compiler scratch."""
    cap = 64 << 20                           # conservative default (v7x per-TC)
    try:
        info = pltpu.get_tpu_info()
        c = getattr(info, "vmem_capacity_bytes", None)
        if c:
            cap = int(c)
    except Exception:
        pass
    return min(int(cap * 0.8), cap - (8 << 20))


def _num_tensorcores():
    """TensorCores that share the grid via 'parallel' dimension_semantics."""
    try:
        info = pltpu.get_tpu_info()
        for name in ("num_cores", "core_count", "num_tensorcores"):
            v = getattr(info, name, None)
            if isinstance(v, int) and v > 0:
                return v
    except Exception:
        pass
    try:
        kind = jax.devices()[0].device_kind.lower()
        if any(t in kind for t in ("v4", "v5p", "v7", "7x")):
            return 2
    except Exception:
        pass
    return 1


# ----------------------------- kernels --------------------------------------


def _mlp_kernel_resident(x_ref, w1_ref, b1_ref, w2_ref, b2_ref, o_ref):
    """Fused fc1 -> ReLU -> fc2 -> sigmoid; both weights resident in VMEM.

    Matmuls run on the MXU in the weights' compute dtype with f32 accumulation;
    the elementwise epilogue stays in f32 (v5e has no bf16 VPU/EUP).
    """
    xc = x_ref[...].astype(w1_ref.dtype)
    h = jnp.dot(xc, w1_ref[...], preferred_element_type=jnp.float32)
    h = jnp.maximum(h + b1_ref[...], 0.0)                        # (tb, Hid) f32
    y = jnp.dot(h.astype(w2_ref.dtype), w2_ref[...],
                preferred_element_type=jnp.float32)
    o_ref[...] = jax.nn.sigmoid(y + b2_ref[...]).astype(o_ref.dtype)


def _mlp_kernel_hid_tiled(x_ref, w1_ref, b1_ref, w2_ref, b2_ref, o_ref,
                          acc_ref):
    """Same fusion, streaming the hidden dim in tk-chunks (oversized weights)."""
    k = pl.program_id(1)

    @pl.when(k == 0)
    def _():
        acc_ref[...] = jnp.zeros_like(acc_ref)

    xc = x_ref[...].astype(w1_ref.dtype)
    h = jnp.dot(xc, w1_ref[...], preferred_element_type=jnp.float32)
    h = jnp.maximum(h + b1_ref[...], 0.0)                         # (tb, tk) f32
    acc_ref[...] += jnp.dot(h.astype(w2_ref.dtype), w2_ref[...],
                            preferred_element_type=jnp.float32)

    @pl.when(k == pl.num_programs(1) - 1)
    def _():
        o_ref[...] = jax.nn.sigmoid(acc_ref[...] + b2_ref[...]).astype(
            o_ref.dtype)


# --------------------------- pallas_call builders ----------------------------


def _build_resident_call(tb, B_p, In_p, Hid_p, Out_p, out_dtype, vmem_limit):
    return pl.pallas_call(
        _mlp_kernel_resident,
        out_shape=jax.ShapeDtypeStruct((B_p, Out_p), out_dtype),
        grid_spec=pltpu.PrefetchScalarGridSpec(
            num_scalar_prefetch=0,
            grid=(B_p // tb,),
            in_specs=[
                pl.BlockSpec((tb, In_p), lambda i: (i, 0)),       # x tile
                pl.BlockSpec((In_p, Hid_p), lambda i: (0, 0)),    # W1 (resident)
                pl.BlockSpec((1, Hid_p), lambda i: (0, 0)),       # b1
                pl.BlockSpec((Hid_p, Out_p), lambda i: (0, 0)),   # W2 (resident)
                pl.BlockSpec((1, Out_p), lambda i: (0, 0)),       # b2
            ],
            out_specs=pl.BlockSpec((tb, Out_p), lambda i: (i, 0)),
        ),
        compiler_params=pltpu.CompilerParams(
            dimension_semantics=("parallel",),   # batch steps shard across TCs
            vmem_limit_bytes=vmem_limit,
        ),
    )


def _build_hid_tiled_call(tb, tk, B_p, In_p, Hid_p, Out_p, out_dtype,
                          vmem_limit):
    return pl.pallas_call(
        _mlp_kernel_hid_tiled,
        out_shape=jax.ShapeDtypeStruct((B_p, Out_p), out_dtype),
        grid_spec=pltpu.PrefetchScalarGridSpec(
            num_scalar_prefetch=0,
            grid=(B_p // tb, Hid_p // tk),
            in_specs=[
                pl.BlockSpec((tb, In_p), lambda i, k: (i, 0)),    # x (per batch)
                pl.BlockSpec((In_p, tk), lambda i, k: (0, k)),    # W1 cols chunk
                pl.BlockSpec((1, tk), lambda i, k: (0, k)),       # b1 chunk
                pl.BlockSpec((tk, Out_p), lambda i, k: (k, 0)),   # W2 rows chunk
                pl.BlockSpec((1, Out_p), lambda i, k: (0, 0)),    # b2
            ],
            out_specs=pl.BlockSpec((tb, Out_p), lambda i, k: (i, 0)),
            scratch_shapes=[pltpu.VMEM((tb, Out_p), jnp.float32)],
        ),
        compiler_params=pltpu.CompilerParams(
            dimension_semantics=("parallel", "arbitrary"),
            vmem_limit_bytes=vmem_limit,
        ),
    )


# ------------------------------ host wrappers ---------------------------------


def prepare_mlp_params(w1, b1, w2, b2, *, compute_dtype=jnp.bfloat16,
                       vmem_budget_bytes=None):
    """Pad + cast the MLP parameters once (call at model init, not per step).

    w1: (In, Hid), w2: (Hid, Out) -- nn.Linear weights pre-transposed.
    compute_dtype: MXU operand dtype (bf16 default; use float32 for exactness).
    """
    In, Hid = w1.shape
    assert w2.shape[0] == Hid
    Out = w2.shape[1]
    In_p, Out_p = _round_up(In, LANE), _round_up(Out, LANE)
    Hid_p = _round_up(Hid, LANE)
    wb = jnp.dtype(compute_dtype).itemsize
    budget = int(vmem_budget_bytes) if vmem_budget_bytes else _vmem_budget_bytes()

    nominal_tb = 256  # only for the residency decision; real tb picked per call

    def weight_fixed(hcols):   # double-buffered weight slabs + f32 biases
        return 2 * (In_p * hcols + hcols * Out_p) * wb + 2 * (hcols + Out_p) * 4

    def per_row(hcols):        # dbl-buffered x/out rows + live f32 h / y / acc
        return 2 * In_p * 4 + 2 * Out_p * 4 + hcols * (4 + wb) + 2 * Out_p * 4

    tk = None
    if weight_fixed(Hid_p) + nominal_tb * per_row(Hid_p) > budget:
        # Weights too big to sit resident: stream the hidden dim in tk chunks.
        n_k = 2
        while True:
            cand = _round_up(_cdiv(Hid_p, n_k), LANE)
            if (weight_fixed(cand) + nominal_tb * per_row(cand) <= budget
                    or cand == LANE):
                tk = cand
                break
            n_k += 1
        Hid_p = _round_up(Hid_p, tk)      # grid divides Hid_p exactly (zero pad)

    return dict(
        w1=_pad2(w1, In_p, Hid_p, compute_dtype),
        b1=_pad2(jnp.asarray(b1).reshape(1, Hid), 1, Hid_p, jnp.float32),
        w2=_pad2(w2, Hid_p, Out_p, compute_dtype),
        b2=_pad2(jnp.asarray(b2).reshape(1, Out), 1, Out_p, jnp.float32),
        dims=(In, Hid, Out, In_p, Hid_p, Out_p),
        tk=tk, wb=wb, budget=budget,
    )


def _choose_tb(B, tb_cap, n_cores):
    """Pick the batch tile: minimise padding, respect VMEM, balance 2-TC chips."""
    tb_cap = max(ROW_ALIGN, (tb_cap // ROW_ALIGN) * ROW_ALIGN)
    target = min(512, tb_cap)
    n_steps = max(1, _cdiv(B, target))
    if n_cores > 1 and B >= 2 * ROW_ALIGN * n_cores:
        # keep both TensorCores busy with an even number of steps (v7x)
        n_steps = _round_up(max(n_steps, n_cores), n_cores)
    tb = min(_round_up(_cdiv(B, n_steps), ROW_ALIGN), target)
    return tb, _cdiv(B, tb)


def mlp_pallas(x, params):
    """y = sigmoid(relu(x @ W1 + b1) @ W2 + b2) using prepare_mlp_params() output."""
    In, Hid, Out, In_p, Hid_p, Out_p = params["dims"]
    tk, wb, budget = params["tk"], params["wb"], params["budget"]
    B = x.shape[0]
    assert x.shape[1] == In, "input feature size mismatch"
    out_dtype = x.dtype
    xb = jnp.dtype(x.dtype).itemsize
    ob = jnp.dtype(out_dtype).itemsize

    hcols = Hid_p if tk is None else tk
    fixed = 2 * (In_p * hcols + hcols * Out_p) * wb + 2 * (hcols + Out_p) * 4
    per_row = 2 * In_p * xb + 2 * Out_p * ob + hcols * (4 + wb) + 2 * Out_p * 4
    tb, n_steps = _choose_tb(B, (budget - fixed) // per_row, _num_tensorcores())
    B_p = n_steps * tb

    # x is only copied when padding is actually required; the compute-dtype
    # cast happens inside the kernel (no extra HBM round-trip for x).
    if B_p != B or In_p != In:
        x = jnp.pad(x, ((0, B_p - B), (0, In_p - In)))

    need = fixed + tb * per_row
    vmem_limit = int(max(32 << 20, min(budget, need + need // 4 + (4 << 20))))

    if tk is None:
        call = _build_resident_call(tb, B_p, In_p, Hid_p, Out_p, out_dtype,
                                    vmem_limit)
    else:
        call = _build_hid_tiled_call(tb, tk, B_p, In_p, Hid_p, Out_p,
                                     out_dtype, vmem_limit)
    out = call(x, params["w1"], params["b1"], params["w2"], params["b2"])
    return out[:B, :Out]


def mlp_reference(x, w1, b1, w2, b2):
    h = jnp.maximum(x @ w1 + b1, 0.0)
    return jax.nn.sigmoid(h @ w2 + b2)


if __name__ == "__main__":
    # --- case 1: small shapes consistent with MLP(input, hidden, output) -----
    batch, input_size, hidden_size, output_size = 8, 32, 64, 8
    k_x, k_w1, k_b1, k_w2, k_b2 = jax.random.split(jax.random.PRNGKey(0), 5)
    x = jax.random.normal(k_x, (batch, input_size), dtype=jnp.float32)
    # nn.Linear weights are (out, in); stored pre-transposed as (in, out).
    w1 = jax.random.normal(k_w1, (input_size, hidden_size), jnp.float32) * 0.1
    b1 = jax.random.normal(k_b1, (hidden_size,), jnp.float32) * 0.1
    w2 = jax.random.normal(k_w2, (hidden_size, output_size), jnp.float32) * 0.1
    b2 = jax.random.normal(k_b2, (output_size,), jnp.float32) * 0.1
    ref = mlp_reference(x, w1, b1, w2, b2)

    params_bf16 = prepare_mlp_params(w1, b1, w2, b2)        # bf16 MXU operands
    out = jax.block_until_ready(mlp_pallas(x, params_bf16))
    assert out.shape == (batch, output_size)
    assert jnp.allclose(out, ref, atol=2e-2, rtol=2e-2), "mismatch (bf16)"

    # explicit f32 compute policy (exactness check)
    params_f32 = prepare_mlp_params(w1, b1, w2, b2, compute_dtype=jnp.float32)
    out_f32 = jax.block_until_ready(mlp_pallas(x, params_f32))
    assert jnp.allclose(out_f32, ref, atol=1e-5, rtol=1e-5), "mismatch (f32)"

    # --- case 2: ragged/unaligned shapes (B=384 splits into exact tiles) -----
    batch2, in2, hid2, out2 = 384, 96, 200, 24
    k_x, k_w1, k_b1, k_w2, k_b2 = jax.random.split(jax.random.PRNGKey(1), 5)
    x2 = jax.random.normal(k_x, (batch2, in2), jnp.float32)
    w1_2 = jax.random.normal(k_w1, (in2, hid2), jnp.float32) * 0.05
    b1_2 = jax.random.normal(k_b1, (hid2,), jnp.float32) * 0.05
    w2_2 = jax.random.normal(k_w2, (hid2, out2), jnp.float32) * 0.05
    b2_2 = jax.random.normal(k_b2, (out2,), jnp.float32) * 0.05
    ref2 = mlp_reference(x2, w1_2, b1_2, w2_2, b2_2)

    p2 = prepare_mlp_params(w1_2, b1_2, w2_2, b2_2)
    out2_k = jax.block_until_ready(mlp_pallas(x2, p2))
    assert out2_k.shape == (batch2, out2)
    assert jnp.allclose(out2_k, ref2, atol=2e-2, rtol=2e-2), "mismatch (big)"

    # --- case 3: force the Hid-tiled (weight-streaming) accumulator path by
    #     shrinking the VMEM budget, to exercise its grid/pl.when logic --------
    p3 = prepare_mlp_params(w1_2, b1_2, w2_2, b2_2, vmem_budget_bytes=1 << 20)
    assert p3["tk"] is not None
    out3 = jax.block_until_ready(mlp_pallas(x2, p3))
    assert jnp.allclose(out3, ref2, atol=2e-2, rtol=2e-2), "mismatch (tiled)"

    print("KERNEL_OK")
</pallas_src>

<mosaic_0001>
module attributes {stable_mosaic.version = 11 : i64} {
  func.func @_mlp_kernel_resident(%arg0: i32, %arg1: memref<16x128xf32, #tpu.memory_space<vmem>>, %arg2: memref<128x128xbf16, #tpu.memory_space<vmem>>, %arg3: memref<1x128xf32, #tpu.memory_space<vmem>>, %arg4: memref<128x128xbf16, #tpu.memory_space<vmem>>, %arg5: memref<1x128xf32, #tpu.memory_space<vmem>>, %arg6: memref<16x128xf32, #tpu.memory_space<vmem>>) attributes {dimension_semantics = [#tpu.dimension_semantics<parallel>], iteration_bounds = array<i64: 1>, scalar_prefetch = 0 : i64, scratch_operands = 0 : i64, tpu.core_type = #tpu.core_type<tc>, window_params = [{transform_indices = @transform_0, window_bounds = array<i64: 16, 128>}, {pipeline_mode = #tpu.pipeline_mode<synchronous>, transform_indices = @transform_1, window_bounds = array<i64: 128, 128>}, {pipeline_mode = #tpu.pipeline_mode<synchronous>, transform_indices = @transform_2, window_bounds = array<i64: 1, 128>}, {pipeline_mode = #tpu.pipeline_mode<synchronous>, transform_indices = @transform_3, window_bounds = array<i64: 128, 128>}, {pipeline_mode = #tpu.pipeline_mode<synchronous>, transform_indices = @transform_4, window_bounds = array<i64: 1, 128>}, {transform_indices = @transform_5, window_bounds = array<i64: 16, 128>}]} {
    %c0 = arith.constant 0 : index
    %c0_0 = arith.constant 0 : index
    %0 = vector.load %arg1[%c0, %c0_0] : memref<16x128xf32, #tpu.memory_space<vmem>>, vector<16x128xf32>
    %1 = arith.truncf %0 : vector<16x128xf32> to vector<16x128xbf16>
    %c0_1 = arith.constant 0 : index
    %c0_2 = arith.constant 0 : index
    %2 = vector.load %arg2[%c0_1, %c0_2] : memref<128x128xbf16, #tpu.memory_space<vmem>>, vector<128x128xbf16>
    %cst = arith.constant dense<0.000000e+00> : vector<16x128xf32>
    %3 = tpu.matmul %1, %2, %cst {dimension_numbers = #tpu.dot_dimension_numbers<[1], [0], [0], [1], [0, 0, 1, 1], [], []>} : vector<16x128xbf16>, vector<128x128xbf16>, vector<16x128xf32> -> vector<16x128xf32>
    %c0_3 = arith.constant 0 : index
    %c0_4 = arith.constant 0 : index
    %4 = vector.load %arg3[%c0_3, %c0_4] : memref<1x128xf32, #tpu.memory_space<vmem>>, vector<1x128xf32>
    %5 = vector.broadcast %4 : vector<1x128xf32> to vector<16x128xf32>
    %6 = arith.addf %3, %5 : vector<16x128xf32>
    %cst_5 = arith.constant 0.000000e+00 : f32
    %7 = vector.broadcast %cst_5 : f32 to vector<16x128xf32>
    %8 = arith.maximumf %6, %7 : vector<16x128xf32>
    %9 = arith.truncf %8 : vector<16x128xf32> to vector<16x128xbf16>
    %c0_6 = arith.constant 0 : index
    %c0_7 = arith.constant 0 : index
    %10 = vector.load %arg4[%c0_6, %c0_7] : memref<128x128xbf16, #tpu.memory_space<vmem>>, vector<128x128xbf16>
    %cst_8 = arith.constant dense<0.000000e+00> : vector<16x128xf32>
    %11 = tpu.matmul %9, %10, %cst_8 {dimension_numbers = #tpu.dot_dimension_numbers<[1], [0], [0], [1], [0, 0, 1, 1], [], []>} : vector<16x128xbf16>, vector<128x128xbf16>, vector<16x128xf32> -> vector<16x128xf32>
    %c0_9 = arith.constant 0 : index
    %c0_10 = arith.constant 0 : index
    %12 = vector.load %arg5[%c0_9, %c0_10] : memref<1x128xf32, #tpu.memory_space<vmem>>, vector<1x128xf32>
    %13 = vector.broadcast %12 : vector<1x128xf32> to vector<16x128xf32>
    %14 = arith.addf %11, %13 : vector<16x128xf32>
    %15 = arith.negf %14 : vector<16x128xf32>
    %16 = math.exp %15 : vector<16x128xf32>
    %cst_11 = arith.constant 1.000000e+00 : f32
    %17 = vector.broadcast %cst_11 : f32 to vector<16x128xf32>
    %18 = arith.addf %17, %16 : vector<16x128xf32>
    %19 = arith.divf %17, %18 : vector<16x128xf32>
    %c0_12 = arith.constant 0 : index
    %c0_13 = arith.constant 0 : index
    %20 = vector.load %arg6[%c0_12, %c0_13] : memref<16x128xf32, #tpu.memory_space<vmem>>, vector<16x128xf32>
    tpu.vector_store %arg6[%c0_12, %c0_13], %19 {strides = array<i32>} : memref<16x128xf32, #tpu.memory_space<vmem>>, vector<16x128xf32>,
    return
  }
  func.func @transform_0(%arg0: i32) -> (i32, i32) {
    %c0_i32 = arith.constant 0 : i32
    %c0_i32_0 = arith.constant 0 : i32
    return %arg0, %c0_i32 : i32, i32
  }
  func.func @transform_1(%arg0: i32) -> (i32, i32) {
    %c0_i32 = arith.constant 0 : i32
    %c0_i32_0 = arith.constant 0 : i32
    %c0_i32_1 = arith.constant 0 : i32
    return %c0_i32, %c0_i32_0 : i32, i32
  }
  func.func @transform_2(%arg0: i32) -> (i32, i32) {
    %c0_i32 = arith.constant 0 : i32
    %c0_i32_0 = arith.constant 0 : i32
    %c0_i32_1 = arith.constant 0 : i32
    return %c0_i32, %c0_i32_0 : i32, i32
  }
  func.func @transform_3(%arg0: i32) -> (i32, i32) {
    %c0_i32 = arith.constant 0 : i32
    %c0_i32_0 = arith.constant 0 : i32
    %c0_i32_1 = arith.constant 0 : i32
    return %c0_i32, %c0_i32_0 : i32, i32
  }
  func.func @transform_4(%arg0: i32) -> (i32, i32) {
    %c0_i32 = arith.constant 0 : i32
    %c0_i32_0 = arith.constant 0 : i32
    %c0_i32_1 = arith.constant 0 : i32
    return %c0_i32, %c0_i32_0 : i32, i32
  }
  func.func @transform_5(%arg0: i32) -> (i32, i32) {
    %c0_i32 = arith.constant 0 : i32
    %c0_i32_0 = arith.constant 0 : i32
    return %arg0, %c0_i32 : i32, i32
  }
}

</mosaic_0001>

<bundles_post_ra>
// kernel: tpu_custom_call.1
= control target key start
LH: loop header
LB: loop body
LE: loop exit
PB: predicated region body
PF: predicated region fallthrough
CT: control target
= control target key end

     0   :  { %10 = vsyncpa [#allocation3], 0  ;;  %s637_s0 = inlined_call_operand.hbm [shape: f32[16,128], index: 0, kind: input, shape index: {}]   ;;  %s638_s1 = inlined_call_operand.hbm [shape: bf16[128,128], index: 1, kind: input, shape index: {}]   ;;  %s639_s2 = inlined_call_operand.vmem [shape: f32[1,128], index: 2, kind: input, shape index: {}]   ;;  %s640_s3 = inlined_call_operand.hbm [shape: bf16[128,128], index: 3, kind: input, shape index: {}]   ;;  %s641_s4 = inlined_call_operand.vmem [shape: f32[1,128], index: 4, kind: input, shape index: {}]   ;;  %s642_s5 = inlined_call_operand.hbm [shape: f32[16,128], index: 5, kind: output, shape index: {}]  }
   0x1   :  { %11 = vsyncpa [#allocation6], 0 }
   0x2   :  { %12 = vsyncpa [#allocation4], 0  ;;  %s531_s18 = smov [#allocation5]   ;;  %s437_s22 = scalar_lea.hbm %s638_s1, 1024 }
   0x3   :  { %s30_s19 = sshll.u32 %s531_s18, 4  ;;  %p438_p0 = scmp.ne.s32.totalorder %s638_s1, %s437_s22  ;;  %s31_s19 = int_to_ptr.vmem [resolvable:$true] %s30_s19 }
   0x4   :  { %p441_p1 = scmp.lt.u32.totalorder %s437_s22, %s638_s1 }
   0x6   :  { %p443_p2 = pnand %p441_p1, %p438_p0 }
   0x8   :  { %446 = shalt.err (!%p443_p2)
}
   0x9   :  { %s447_s27 = scalar_lea.vmem %s31_s19, 1024  ;;  %p452_p4 = scmp.lt.s32.totalorder %s31_s19, %s31_s19 }
   0xa   :  { %p448_p3 = scmp.ne.s32.totalorder %s31_s19, %s447_s27  ;;  %p453_p5 = scmp.lt.s32.totalorder %s447_s27, %s447_s27 }
   0xc   :  { %p454_p6 = por %p453_p5, %p452_p4 }
   0xe   :  { %p455_p7 = pnand %p454_p6, %p448_p3 }
  0x10   :  { %458 = shalt.err (!%p455_p7)
}
  0x11   :  { %s532_s28 = smov 64   ;;  %s533_s29 = smov 4  }
  0x12   :  { %36 = dma.hbm_to_vmem [thread:$0]  %s638_s1, 1024, %s31_s19, [#allocation6], %s532_s28, %s532_s28, %s533_s29  }
  0x13   :  { %s534_s7 = smov [#allocation2]   ;;  %s459_s11 = scalar_lea.hbm %s637_s0, 256 }
  0x14   :  { %s18_s8 = sshll.u32 %s534_s7, 4  ;;  %p460_p8 = scmp.ne.s32.totalorder %s637_s0, %s459_s11  ;;  %s19_s8 = int_to_ptr.vmem [resolvable:$true] %s18_s8 }
  0x15   :  { %p463_p9 = scmp.lt.u32.totalorder %s459_s11, %s637_s0 }
  0x17   :  { %p465_p10 = pnand %p463_p9, %p460_p8 }
  0x19   :  { %468 = shalt.err (!%p465_p10)
}
  0x1a   :  { %s469_s16 = scalar_lea.vmem %s19_s8, 256  ;;  %p474_p12 = scmp.lt.s32.totalorder %s19_s8, %s19_s8 }
  0x1b   :  { %p470_p11 = scmp.ne.s32.totalorder %s19_s8, %s469_s16  ;;  %p475_p13 = scmp.lt.s32.totalorder %s469_s16, %s469_s16 }
  0x1d   :  { %p476_p0 = por %p475_p13, %p474_p12 }
  0x1f   :  { %p477_p1 = pnand %p476_p0, %p470_p11 }
  0x21   :  { %480 = shalt.err (!%p477_p1)
}
  0x22   :  { %s535_s1 = smov 128   ;;  %s536_s17 = smov 8  }
  0x23   :  { %24 = dma.hbm_to_vmem [thread:$0]  %s637_s0, 256, %s19_s8, [#allocation3], %s535_s1, %s535_s1, %s536_s17  }
  0x24   :  { %s537_s20 = smov [#allocation7]   ;;  %s481_s24 = scalar_lea.hbm %s640_s3, 1024 }
  0x25   :  { %s44_s21 = sshll.u32 %s537_s20, 4  ;;  %p482_p2 = scmp.ne.s32.totalorder %s640_s3, %s481_s24  ;;  %s45_s21 = int_to_ptr.vmem [resolvable:$true] %s44_s21 }
  0x26   :  { %p485_p3 = scmp.lt.u32.totalorder %s481_s24, %s640_s3 }
  0x28   :  { %p487_p4 = pnand %p485_p3, %p482_p2 }
  0x2a   :  { %490 = shalt.err (!%p487_p4)
}
  0x2b   :  { %s491_s6 = scalar_lea.vmem %s45_s21, 1024  ;;  %p496_p6 = scmp.lt.s32.totalorder %s45_s21, %s45_s21 }
  0x2c   :  { %p492_p5 = scmp.ne.s32.totalorder %s45_s21, %s491_s6  ;;  %p497_p7 = scmp.lt.s32.totalorder %s491_s6, %s491_s6 }
  0x2e   :  { %p498_p8 = por %p497_p7, %p496_p6 }
  0x30   :  { %p499_p9 = pnand %p498_p8, %p492_p5 }
  0x32   :  { %502 = shalt.err (!%p499_p9)
}
  0x33   :  { %50 = dma.hbm_to_vmem [thread:$0]  %s640_s3, 1024, %s45_s21, [#allocation6], %s532_s28, %s532_s28, %s533_s29  }
  0x34   :  { %525 = dma.done.wait [#allocation3], 256  }
  0x35   :  { %526 = vsyncadd [#allocation3], 4294967040 }
  0x36   :  { %527 = dma.done.wait [#allocation6], 2048  }
  0x37   :  { %528 = vsyncadd [#allocation6], 4294965248  ;;  %v538_v0 = vmov 0.0   ;;  %vm539_vm0 = vmmov 0   ;;  %v413_v1 = vld [vmem:[#allocation5] sm:$0xff]   ;;  %v414_v2 = vld [vmem:[#allocation5 + $0x8] sm:$0xff]  }
  0x38   :  { %363 = vmatprep.subr.bf16.mxu0 %v538_v0  ;;  %379 = vmatprep.mubr.msk.bf16.mxu0 %vm539_vm0, %v538_v0  ;;  %v415_v3 = vld [vmem:[#allocation5 + $0x10] sm:$0xff]   ;;  %v421_v4 = vld [vmem:[#allocation7] sm:$0xff]   ;;  %v416_v5 = vld [vmem:[#allocation5 + $0x18] sm:$0xff]  }
  0x39   :  { %383 = vmatprep.subr.bf16.mxu1 %v538_v0  ;;  %399 = vmatprep.mubr.msk.bf16.mxu1 %vm539_vm0, %v538_v0  ;;  %v422_v6 = vld [vmem:[#allocation7 + $0x8] sm:$0xff]   ;;  %v417_v7 = vld [vmem:[#allocation5 + $0x20] sm:$0xff]   ;;  %v423_v8 = vld [vmem:[#allocation7 + $0x10] sm:$0xff]  }
  0x3a   :  { %364 = vmatpush3.bf16.msra.mxu0 %v413_v1  ;;  %384 = vmatpush3.bf16.msra.mxu1 %v421_v4  ;;  %v418_v9 = vld [vmem:[#allocation5 + $0x28] sm:$0xff]   ;;  %v424_v10 = vld [vmem:[#allocation7 + $0x18] sm:$0xff]   ;;  %v419_v11 = vld [vmem:[#allocation5 + $0x30] sm:$0xff]  }
  0x3b   :  { %365 = vmatprep.subr.bf16.mxu0 %v538_v0  ;;  %385 = vmatprep.subr.bf16.mxu1 %v538_v0  ;;  %v425_v12 = vld [vmem:[#allocation7 + $0x20] sm:$0xff]   ;;  %v420_v13 = vld [vmem:[#allocation5 + $0x38] sm:$0xff]   ;;  %v63_v14 = vld [vmem:[#allocation2] sm:$0xff] }
  0x3c   :  { %v64_v15 = vld [vmem:[#allocation2 + $0x8] sm:$0xff]  ;;  %v426_v16 = vld [vmem:[#allocation7 + $0x28] sm:$0xff]   ;;  %v427_v18 = vld [vmem:[#allocation7 + $0x30] sm:$0xff]  }
  0x3d   :  { %v65_v17 = vpack.c.bf16 %v64_v15, %v63_v14  ;;  %v428_v19 = vld [vmem:[#allocation7 + $0x38] sm:$0xff]   ;;  %v325_v20 = vld [vmem:[%s639_s2] ss:$0 sm:$0xff]  ;;  %s540_s2 = smov [#allocation8]  }
  0x3e   :  { %366 = vmatpush3.bf16.msra.mxu0 %v414_v2  ;;  %386 = vmatpush3.bf16.msra.mxu1 %v422_v6  ;;  %v334_v30 = vld [vmem:[%s641_s4] ss:$0 sm:$0xff]  ;;  %s312_s9 = sshll.u32 %s540_s2, 4  ;;  %s313_s9 = int_to_ptr.vmem [resolvable:$true] %s312_s9 }
  0x3f   :  { %367 = vmatprep.subr.bf16.mxu0 %v538_v0  ;;  %387 = vmatprep.subr.bf16.mxu1 %v538_v0  ;;  %s503_s4 = scalar_lea.vmem %s313_s9, 256  ;;  %p508_p11 = scmp.lt.s32.totalorder %s313_s9, %s313_s9 }
  0x40   :  { %p504_p10 = scmp.ne.s32.totalorder %s313_s9, %s503_s4  ;;  %p509_p12 = scmp.lt.s32.totalorder %s503_s4, %s503_s4 }
  0x42   :  { %368 = vmatpush3.bf16.msra.mxu0 %v415_v3  ;;  %388 = vmatpush3.bf16.msra.mxu1 %v423_v8  ;;  %p510_p13 = por %p509_p12, %p508_p11 }
  0x43   :  { %369 = vmatprep.subr.bf16.mxu0 %v538_v0  ;;  %389 = vmatprep.subr.bf16.mxu1 %v538_v0 }
  0x44   :  { %p511_p0 = pnand %p510_p13, %p504_p10 }
  0x46   :  { %370 = vmatpush3.bf16.msra.mxu0 %v416_v5  ;;  %390 = vmatpush3.bf16.msra.mxu1 %v424_v10 }
  0x47   :  { %371 = vmatprep.subr.bf16.mxu0 %v538_v0  ;;  %391 = vmatprep.subr.bf16.mxu1 %v538_v0 }
  0x4a   :  { %372 = vmatpush3.bf16.msra.mxu0 %v417_v7  ;;  %392 = vmatpush3.bf16.msra.mxu1 %v425_v12 }
  0x4b   :  { %373 = vmatprep.subr.bf16.mxu0 %v538_v0  ;;  %393 = vmatprep.subr.bf16.mxu1 %v538_v0 }
  0x4e   :  { %374 = vmatpush3.bf16.msra.mxu0 %v418_v9  ;;  %394 = vmatpush3.bf16.msra.mxu1 %v426_v16 }
  0x4f   :  { %375 = vmatprep.subr.bf16.mxu0 %v538_v0  ;;  %395 = vmatprep.subr.bf16.mxu1 %v538_v0 }
  0x52   :  { %376 = vmatpush3.bf16.msra.mxu0 %v419_v11  ;;  %396 = vmatpush3.bf16.msra.mxu1 %v427_v18 }
  0x53   :  { %377 = vmatprep.subr.bf16.mxu0 %v538_v0  ;;  %397 = vmatprep.subr.bf16.mxu1 %v538_v0 }
  0x56   :  { %378 = vmatpush3.bf16.msra.mxu0 %v420_v13  ;;  %398 = vmatpush3.bf16.msra.mxu1 %v428_v19 }
  0x59   :  { %380 = vmatmul.mubr.bf16.vlgmr.msra.gmra.mrb[0].mxu0 %v65_v17 }
 0x12c   :  { %v171_v21 = vpop.f32.mrb[0].mxu0 }
 0x12d   :  { %v172_v22 = vadd.f32 %v325_v20, %v171_v21  ;;  %v381_v23 = vpop.f32.mrb[1].mxu0 }
 0x12e   :  { %v174_v24 = vpop.f32.mrb[2].mxu0 }
 0x12f   :  { %v175_v25 = vadd.f32 %v325_v20, %v174_v24  ;;  %v382_v26 = vpop.f32.mrb[3].mxu0  ;;  %v178_v27 = vmax.f32 %v172_v22, 0.0 }
 0x131   :  { %v179_v28 = vmax.f32 %v175_v25, 0.0 }
 0x133   :  { %v180_v29 = vpack.c.bf16 %v179_v28, %v178_v27 }
 0x135   :  { %400 = vmatmul.mubr.bf16.vlgmr.msra.gmra.mrb[0].mxu1 %v180_v29 }
 0x208   :  { %v286_v31 = vpop.f32.mrb[0].mxu1 }
 0x209   :  { %v287_v32 = vadd.f32 %v334_v30, %v286_v31  ;;  %v401_v33 = vpop.f32.mrb[1].mxu1 }
 0x20a   :  { %v289_v34 = vpop.f32.mrb[2].mxu1 }
 0x20b   :  { %v343_v35 = vmul.f32 -1.442695, %v287_v32  ;;  %v290_v36 = vadd.f32 %v334_v30, %v289_v34  ;;  %v402_v37 = vpop.f32.mrb[3].mxu1 }
 0x20d   :  { %429 = vpow2.f32 %v343_v35  ;;  %v344_v38 = vmul.f32 -1.442695, %v290_v36 }
 0x20f   :  { %431 = vpow2.f32 %v344_v38 }
 0x217   :  { %v430_v39 = vpop.eup %429 }
 0x218   :  { %v299_v40 = vadd.f32 1.0, %v430_v39 }
 0x219   :  { %v432_v41 = vpop.eup %431 }
 0x21a   :  { %433 = vrcp.f32 %v299_v40  ;;  %v300_v42 = vadd.f32 1.0, %v432_v41 }
 0x21c   :  { %435 = vrcp.f32 %v300_v42 }
 0x224   :  { %v434_v43 = vpop.eup %433 }
 0x225   :  { %305 = vst [vmem:[#allocation8] sm:$0xff] %v434_v43 }
 0x226   :  { %v436_v44 = vpop.eup %435 }
 0x227   :  { %306 = vst [vmem:[#allocation8 + $0x8] sm:$0xff] %v436_v44 }
 0x228   :  { %514 = shalt.err (!%p511_p0)
}
 0x229   :  { %s515_s12 = scalar_lea.hbm %s642_s5, 256 }
 0x22a   :  { %p516_p1 = scmp.ne.s32.totalorder %s642_s5, %s515_s12  ;;  %p519_p2 = scmp.lt.u32.totalorder %s515_s12, %s642_s5 }
 0x22c   :  { %p521_p3 = pnand %p519_p2, %p516_p1 }
 0x22e   :  { %524 = shalt.err (!%p521_p3)
}
 0x22f   :  { %318 = dma.vmem_to_hbm [thread:$0]  %s313_s9, 256, %s642_s5, [#allocation4], %s535_s1, %s535_s1, %s536_s17  }
 0x230   :  { %529 = dma.done.wait [#allocation4], 256  }
 0x231   :  { %530 = vsyncadd [#allocation4], 4294967040 }
 0x232   :  { %322 = vsyncpa [#allocation3], 1 }
 0x233   :  { %323 = vsyncpa [#allocation6], 1 }
 0x234   :  { %324 = vsyncpa [#allocation4], 1 }

</bundles_post_ra>
